<compile_context>
chip_gen: v7x
topology: tpu7x:2x2x1
jax: 0.10.0
libtpu: 0.0.40
codegen_flags: <defaults>
</compile_context>

<pallas_src>
import jax
import jax.numpy as jnp
from jax.experimental import pallas as pl
from jax.experimental.pallas import tpu as pltpu

BN_EPS = 1e-5
TILE_B_MAX = 4096  # multiple of 128; ~6 MiB of double-buffered VMEM at this size


def _round_up(n, m):
    return ((n + m - 1) // m) * m


# ----------------------------------------------------------------------------
# Kernel: one batch tile of the (BN-folded) 3-layer MLP head. All f32.
# ----------------------------------------------------------------------------
def gq_head_kernel(x_ref, w1_ref, b1_ref, w2_ref, b2_ref, w3_ref, b3_ref, out_ref):
    x = x_ref[...]                                                        # (tb, 64) f32

    # Layer 1: Linear(64,64) [BN folded] + ReLU   (Dropout = identity in eval)
    z1 = jnp.dot(x, w1_ref[...], preferred_element_type=jnp.float32) + b1_ref[...]
    h1 = jnp.maximum(z1, 0.0)                                             # (tb, 64)

    # Layer 2: Linear(64,32) [BN folded] + ReLU
    z2 = jnp.dot(h1, w2_ref[...], preferred_element_type=jnp.float32) + b2_ref[...]
    h2 = jnp.maximum(z2, 0.0)                                             # (tb, 32)

    # Output layer: Linear(32,1).  N=1 -> skip the MXU: VPU multiply by the
    # broadcast w3 row, XLU cross-lane sum, scalar bias add.
    out_ref[...] = jnp.sum(h2 * w3_ref[...], axis=-1, keepdims=True) + b3_ref[...]


# ----------------------------------------------------------------------------
# Wrapper
# ----------------------------------------------------------------------------
def _choose_tile(B):
    """Static batch-tile selection (B is a Python int at trace time)."""
    if B <= 128:
        return B  # single full-extent block (always a legal block shape)
    # >= 2 grid steps for mid-size batches so both v7x TensorCores get work;
    # cap at TILE_B_MAX for large B.
    return min(TILE_B_MAX, _round_up(pl.cdiv(B, 2), 128))


@jax.jit
def gq_head_forward(x, folded_params):
    """x: (B, 64) float32 -> (B,) float32 (matches torch .view(-1)).

    folded_params: (w1, b1, w2, b2, w3_row, b3) with BN already folded in
    (all float32), as produced by prepare_params(). w3_row has shape (1, 32).
    """
    w1, b1, w2, b2, w3_row, b3 = folded_params
    B = x.shape[0]
    x = x.astype(jnp.float32)

    tb = _choose_tile(B)
    num_tiles = pl.cdiv(B, tb)  # partial tail block handled by Pallas masking

    flops = 2 * B * (64 * 64 + 64 * 32 + 32)
    bytes_accessed = (
        B * 64 * 4                              # x (f32)
        + B * 4                                 # output (f32)
        + (64 * 64 + 64 + 64 * 32 + 32 + 32 + 1) * 4  # weights + biases (f32)
    )

    out = pl.pallas_call(
        gq_head_kernel,
        out_shape=jax.ShapeDtypeStruct((B, 1), jnp.float32),
        grid=(num_tiles,),
        in_specs=[
            pl.BlockSpec((tb, 64), lambda i: (i, 0)),    # x tile (pipelined)
            pl.BlockSpec((64, 64), lambda i: (0, 0)),    # w1 (resident)
            pl.BlockSpec((1, 64), lambda i: (0, 0)),     # b1
            pl.BlockSpec((64, 32), lambda i: (0, 0)),    # w2
            pl.BlockSpec((1, 32), lambda i: (0, 0)),     # b2
            pl.BlockSpec((1, 32), lambda i: (0, 0)),     # w3 row (transposed)
            pl.BlockSpec((1, 1), lambda i: (0, 0)),      # b3
        ],
        out_specs=pl.BlockSpec((tb, 1), lambda i: (i, 0)),
        compiler_params=pltpu.CompilerParams(
            dimension_semantics=("parallel",),
        ),
        cost_estimate=pl.CostEstimate(
            flops=flops, transcendentals=0, bytes_accessed=bytes_accessed
        ),
    )(x, w1, b1, w2, b2, w3_row, b3)

    return out.reshape(-1)  # metadata-only reshape; no tail slicing needed


# ----------------------------------------------------------------------------
# Parameter construction / BN folding
# ----------------------------------------------------------------------------
def init_params(key):
    """Deterministic parameter init matching gq_head shapes (prev_dim=64, dims=[64,32], out=1)."""
    ks = jax.random.split(key, 6)

    def lin(kw, kb, fan_in, fan_out):
        bound = 1.0 / jnp.sqrt(float(fan_in))
        # stored as (in, out) == transpose of torch's (out, in)
        w = jax.random.uniform(kw, (fan_in, fan_out), jnp.float32, -bound, bound)
        b = jax.random.uniform(kb, (1, fan_out), jnp.float32, -bound, bound)
        return w, b

    w1, b1 = lin(ks[0], ks[1], 64, 64)
    w2, b2 = lin(ks[2], ks[3], 64, 32)
    w3, b3 = lin(ks[4], ks[5], 32, 1)

    def bn(dim, seed):
        k = jax.random.PRNGKey(seed)
        ka, kb2, kc = jax.random.split(k, 3)
        gamma = 1.0 + 0.1 * jax.random.normal(ka, (1, dim), jnp.float32)
        beta = 0.1 * jax.random.normal(kb2, (1, dim), jnp.float32)
        mean = 0.05 * jax.random.normal(kc, (1, dim), jnp.float32)  # pretend running_mean
        var = jnp.ones((1, dim), jnp.float32) + 0.1                 # pretend running_var
        return gamma, beta, mean, var

    g1, be1, m1, v1 = bn(64, 100)
    g2, be2, m2, v2 = bn(32, 200)

    return (w1, b1, g1, be1, m1, v1,
            w2, b2, g2, be2, m2, v2,
            w3, b3)


def _fold_bn(w, b, gamma, beta, mean, var):
    """Fold eval-mode BatchNorm1d into the preceding Linear (exact affine identity)."""
    scale = gamma * jax.lax.rsqrt(var + BN_EPS)   # (1, out)
    w_f = w * scale                               # scale each output column
    b_f = (b - mean) * scale + beta
    return w_f, b_f


def prepare_params(raw_params):
    """Fold BN into Linear weights; keep everything f32; w3 stored as a (1,32) row."""
    (w1, b1, g1, be1, m1, v1,
     w2, b2, g2, be2, m2, v2,
     w3, b3) = raw_params
    w1f, b1f = _fold_bn(w1, b1, g1, be1, m1, v1)
    w2f, b2f = _fold_bn(w2, b2, g2, be2, m2, v2)
    return (w1f, b1f, w2f, b2f, jnp.transpose(w3), b3)   # w3: (32,1) -> (1,32)


# ----------------------------------------------------------------------------
# Pure-JAX references
# ----------------------------------------------------------------------------
def _bn_eval(z, gamma, beta, mean, var):
    scale = gamma * jax.lax.rsqrt(var + BN_EPS)
    return (z - mean) * scale + beta


def reference_forward_f32(x, raw_params):
    """Full-precision eval-mode reference (un-folded BN)."""
    (w1, b1, g1, be1, m1, v1,
     w2, b2, g2, be2, m2, v2,
     w3, b3) = raw_params
    h1 = jnp.maximum(_bn_eval(x @ w1 + b1, g1, be1, m1, v1), 0.0)
    h2 = jnp.maximum(_bn_eval(h1 @ w2 + b2, g2, be2, m2, v2), 0.0)
    return (h2 @ w3 + b3).reshape(-1)


def reference_forward_folded(x, folded_params):
    """Same folded-BN f32 path as the kernel, in plain jnp."""
    w1, b1, w2, b2, w3_row, b3 = folded_params
    h1 = jnp.maximum(x @ w1 + b1, 0.0)
    h2 = jnp.maximum(h1 @ w2 + b2, 0.0)
    return (jnp.sum(h2 * w3_row, axis=-1, keepdims=True) + b3).reshape(-1)


# ----------------------------------------------------------------------------
if __name__ == "__main__":
    key = jax.random.PRNGKey(0)
    kx1, kx2, kp = jax.random.split(key, 3)

    raw_params = init_params(kp)
    folded_params = prepare_params(raw_params)

    # Case 1: small batch (single full-extent block, grid=1).
    B1 = 8
    x1 = jax.random.normal(kx1, (B1, 64), jnp.float32)
    out1 = jax.block_until_ready(gq_head_forward(x1, folded_params))
    assert out1.shape == (B1,)
    assert jnp.allclose(out1, reference_forward_folded(x1, folded_params),
                        atol=1e-2, rtol=1e-2), "mismatch vs. folded f32 reference (B=8)"
    assert jnp.allclose(out1, reference_forward_f32(x1, raw_params),
                        atol=5e-2, rtol=5e-2), "mismatch vs. f32 reference (B=8)"

    # Case 2: multi-tile batch with a non-multiple tail
    # (tb=256, grid=2, last block partially masked -> exercises grid + implicit tail masking).
    B2 = 300
    x2 = jax.random.normal(kx2, (B2, 64), jnp.float32)
    out2 = jax.block_until_ready(gq_head_forward(x2, folded_params))
    assert out2.shape == (B2,)
    assert jnp.allclose(out2, reference_forward_folded(x2, folded_params),
                        atol=1e-2, rtol=1e-2), "mismatch vs. folded f32 reference (B=300)"
    assert jnp.allclose(out2, reference_forward_f32(x2, raw_params),
                        atol=5e-2, rtol=5e-2), "mismatch vs. f32 reference (B=300)"

    print("KERNEL_OK")
</pallas_src>

<mosaic_0001>
module attributes {stable_mosaic.version = 11 : i64} {
  func.func @gq_head_kernel(%arg0: i32, %arg1: memref<8x64xf32, #tpu.memory_space<vmem>>, %arg2: memref<64x64xf32, #tpu.memory_space<vmem>>, %arg3: memref<1x64xf32, #tpu.memory_space<vmem>>, %arg4: memref<64x32xf32, #tpu.memory_space<vmem>>, %arg5: memref<1x32xf32, #tpu.memory_space<vmem>>, %arg6: memref<1x32xf32, #tpu.memory_space<vmem>>, %arg7: memref<1x1xf32, #tpu.memory_space<vmem>>, %arg8: memref<8x1xf32, #tpu.memory_space<vmem>>) attributes {dimension_semantics = [#tpu.dimension_semantics<parallel>], iteration_bounds = array<i64: 1>, scalar_prefetch = 0 : i64, scratch_operands = 0 : i64, tpu.core_type = #tpu.core_type<tc>, window_params = [{transform_indices = @transform_0, window_bounds = array<i64: 8, 64>}, {pipeline_mode = #tpu.pipeline_mode<synchronous>, transform_indices = @transform_1, window_bounds = array<i64: 64, 64>}, {pipeline_mode = #tpu.pipeline_mode<synchronous>, transform_indices = @transform_2, window_bounds = array<i64: 1, 64>}, {pipeline_mode = #tpu.pipeline_mode<synchronous>, transform_indices = @transform_3, window_bounds = array<i64: 64, 32>}, {pipeline_mode = #tpu.pipeline_mode<synchronous>, transform_indices = @transform_4, window_bounds = array<i64: 1, 32>}, {pipeline_mode = #tpu.pipeline_mode<synchronous>, transform_indices = @transform_5, window_bounds = array<i64: 1, 32>}, {pipeline_mode = #tpu.pipeline_mode<synchronous>, transform_indices = @transform_6, window_bounds = array<i64: 1, 1>}, {transform_indices = @transform_7, window_bounds = array<i64: 8, 1>}]} {
    %c0 = arith.constant 0 : index
    %c0_0 = arith.constant 0 : index
    %0 = vector.load %arg1[%c0, %c0_0] : memref<8x64xf32, #tpu.memory_space<vmem>>, vector<8x64xf32>
    %c0_1 = arith.constant 0 : index
    %c0_2 = arith.constant 0 : index
    %1 = vector.load %arg2[%c0_1, %c0_2] : memref<64x64xf32, #tpu.memory_space<vmem>>, vector<64x64xf32>
    %cst = arith.constant dense<0.000000e+00> : vector<8x64xf32>
    %2 = tpu.matmul %0, %1, %cst {dimension_numbers = #tpu.dot_dimension_numbers<[1], [0], [0], [1], [0, 0, 1, 1], [], []>} : vector<8x64xf32>, vector<64x64xf32>, vector<8x64xf32> -> vector<8x64xf32>
    %c0_3 = arith.constant 0 : index
    %c0_4 = arith.constant 0 : index
    %3 = vector.load %arg3[%c0_3, %c0_4] : memref<1x64xf32, #tpu.memory_space<vmem>>, vector<1x64xf32>
    %4 = vector.broadcast %3 : vector<1x64xf32> to vector<8x64xf32>
    %5 = arith.addf %2, %4 : vector<8x64xf32>
    %cst_5 = arith.constant 0.000000e+00 : f32
    %6 = vector.broadcast %cst_5 : f32 to vector<8x64xf32>
    %7 = arith.maximumf %5, %6 : vector<8x64xf32>
    %c0_6 = arith.constant 0 : index
    %c0_7 = arith.constant 0 : index
    %8 = vector.load %arg4[%c0_6, %c0_7] : memref<64x32xf32, #tpu.memory_space<vmem>>, vector<64x32xf32>
    %cst_8 = arith.constant dense<0.000000e+00> : vector<8x32xf32>
    %9 = tpu.matmul %7, %8, %cst_8 {dimension_numbers = #tpu.dot_dimension_numbers<[1], [0], [0], [1], [0, 0, 1, 1], [], []>} : vector<8x64xf32>, vector<64x32xf32>, vector<8x32xf32> -> vector<8x32xf32>
    %c0_9 = arith.constant 0 : index
    %c0_10 = arith.constant 0 : index
    %10 = vector.load %arg5[%c0_9, %c0_10] : memref<1x32xf32, #tpu.memory_space<vmem>>, vector<1x32xf32>
    %11 = vector.broadcast %10 : vector<1x32xf32> to vector<8x32xf32>
    %12 = arith.addf %9, %11 : vector<8x32xf32>
    %cst_11 = arith.constant 0.000000e+00 : f32
    %13 = vector.broadcast %cst_11 : f32 to vector<8x32xf32>
    %14 = arith.maximumf %12, %13 : vector<8x32xf32>
    %c0_12 = arith.constant 0 : index
    %c0_13 = arith.constant 0 : index
    %15 = vector.load %arg6[%c0_12, %c0_13] : memref<1x32xf32, #tpu.memory_space<vmem>>, vector<1x32xf32>
    %16 = vector.broadcast %15 : vector<1x32xf32> to vector<8x32xf32>
    %17 = arith.mulf %14, %16 : vector<8x32xf32>
    %cst_14 = arith.constant dense<0.000000e+00> : vector<8xf32>
    %18 = vector.multi_reduction <add>, %17, %cst_14 [1] : vector<8x32xf32> to vector<8xf32>
    %19 = vector.shape_cast %18 : vector<8xf32> to vector<8x1xf32>
    %c0_15 = arith.constant 0 : index
    %c0_16 = arith.constant 0 : index
    %20 = vector.load %arg7[%c0_15, %c0_16] : memref<1x1xf32, #tpu.memory_space<vmem>>, vector<1x1xf32>
    %21 = vector.broadcast %20 : vector<1x1xf32> to vector<8x1xf32>
    %22 = arith.addf %19, %21 : vector<8x1xf32>
    %c0_17 = arith.constant 0 : index
    %c0_18 = arith.constant 0 : index
    %23 = vector.load %arg8[%c0_17, %c0_18] : memref<8x1xf32, #tpu.memory_space<vmem>>, vector<8x1xf32>
    tpu.vector_store %arg8[%c0_17, %c0_18], %22 {strides = array<i32>} : memref<8x1xf32, #tpu.memory_space<vmem>>, vector<8x1xf32>,
    return
  }
  func.func @transform_0(%arg0: i32) -> (i32, i32) {
    %c0_i32 = arith.constant 0 : i32
    %c0_i32_0 = arith.constant 0 : i32
    return %arg0, %c0_i32 : i32, i32
  }
  func.func @transform_1(%arg0: i32) -> (i32, i32) {
    %c0_i32 = arith.constant 0 : i32
    %c0_i32_0 = arith.constant 0 : i32
    %c0_i32_1 = arith.constant 0 : i32
    return %c0_i32, %c0_i32_0 : i32, i32
  }
  func.func @transform_2(%arg0: i32) -> (i32, i32) {
    %c0_i32 = arith.constant 0 : i32
    %c0_i32_0 = arith.constant 0 : i32
    %c0_i32_1 = arith.constant 0 : i32
    return %c0_i32, %c0_i32_0 : i32, i32
  }
  func.func @transform_3(%arg0: i32) -> (i32, i32) {
    %c0_i32 = arith.constant 0 : i32
    %c0_i32_0 = arith.constant 0 : i32
    %c0_i32_1 = arith.constant 0 : i32
    return %c0_i32, %c0_i32_0 : i32, i32
  }
  func.func @transform_4(%arg0: i32) -> (i32, i32) {
    %c0_i32 = arith.constant 0 : i32
    %c0_i32_0 = arith.constant 0 : i32
    %c0_i32_1 = arith.constant 0 : i32
    return %c0_i32, %c0_i32_0 : i32, i32
  }
  func.func @transform_5(%arg0: i32) -> (i32, i32) {
    %c0_i32 = arith.constant 0 : i32
    %c0_i32_0 = arith.constant 0 : i32
    %c0_i32_1 = arith.constant 0 : i32
    return %c0_i32, %c0_i32_0 : i32, i32
  }
  func.func @transform_6(%arg0: i32) -> (i32, i32) {
    %c0_i32 = arith.constant 0 : i32
    %c0_i32_0 = arith.constant 0 : i32
    %c0_i32_1 = arith.constant 0 : i32
    return %c0_i32, %c0_i32_0 : i32, i32
  }
  func.func @transform_7(%arg0: i32) -> (i32, i32) {
    %c0_i32 = arith.constant 0 : i32
    %c0_i32_0 = arith.constant 0 : i32
    return %arg0, %c0_i32 : i32, i32
  }
}

</mosaic_0001>

<bundles_post_ra>
// kernel: gq_head_forward.1
= control target key start
LH: loop header
LB: loop body
LE: loop exit
PB: predicated region body
PF: predicated region fallthrough
CT: control target
= control target key end

     0   :  { %v323_v0 = vmov 0.0|0.0   ;;  %vm324_vm0 = vmmov 0   ;;  %v325_v4 = vmov 0.0   ;;  %vm44_vm1 = vcmask 523264   ;;  %s432_s1 = inlined_call_operand.vmem [shape: f32[64,64], index: 1, kind: input, shape index: {}]   ;;  %s433_s3 = inlined_call_operand.vmem [shape: f32[64,32], index: 3, kind: input, shape index: {}]   ;;  %s434_s0 = inlined_call_operand.vmem [shape: f32[8,64], index: 0, kind: input, shape index: {}]   ;;  %s435_s2 = inlined_call_operand.vmem [shape: f32[1,64], index: 2, kind: input, shape index: {}]   ;;  %s436_s6 = inlined_call_operand.<no memory space> [shape: f32[1,1], index: 6, kind: input, shape index: {}]   ;;  %s437_s4 = inlined_call_operand.vmem [shape: f32[1,32], index: 4, kind: input, shape index: {}]   ;;  %s438_s5 = inlined_call_operand.vmem [shape: f32[1,32], index: 5, kind: input, shape index: {}]   ;;  %s439_s7 = inlined_call_operand.vmem [shape: f32[8,1], index: 7, kind: output, shape index: {}]  }
   0x1   :  { %296 = vmatprep.subr.bf16.mxu0 %v323_v0  ;;  %v29_v1 = vld [vmem:[%s432_s1] sm:$0xff]  ;;  %v30_v2 = vld [vmem:[%s432_s1 + $0x8] sm:$0xff]  ;;  %v31_v3 = vld [vmem:[%s432_s1 + $0x10] sm:$0xff]  ;;  %274 = vmatprep.mubr.msk.f32.mxu0 %vm324_vm0, %v325_v4  ;;  %v12_v32 = vstv %s436_s6  ;;  %vm216_vm2 = vcmask 261120   ;;  %vm228_vm3 = vcmask 7168  }
   0x2   :  { %v297_v5 = vpack.c.bf16 %v30_v2, %v29_v1  ;;  %v32_v6 = vld [vmem:[%s432_s1 + $0x18] sm:$0xff]  ;;  %308 = vmatprep.subr.bf16.mxu1 %v323_v0  ;;  %293 = vmatprep.mubr.msk.f32.mxu1 %vm324_vm0, %v325_v4  ;;  %v119_v8 = vld [vmem:[%s433_s3] sm:$0xff]  ;;  %v120_v9 = vld [vmem:[%s433_s3 + $0x8] sm:$0xff]  ;;  %13 = vst [vmem:[#allocation2] sm:$0x1] %v12_v32 }
   0x3   :  { %v300_v7 = vpack.c.bf16 %v32_v6, %v31_v3  ;;  %v121_v10 = vld [vmem:[%s433_s3 + $0x10] sm:$0xff]  ;;  %v33_v11 = vld [vmem:[%s432_s1 + $0x20] sm:$0xff]  ;;  %v34_v12 = vld [vmem:[%s432_s1 + $0x28] sm:$0xff]  ;;  %v309_v13 = vpack.c.bf16 %v120_v9, %v119_v8 }
   0x4   :  { %298 = vmatpush3.bf16.msra.mxu0 %v297_v5  ;;  %v122_v14 = vld [vmem:[%s433_s3 + $0x18] sm:$0xff]  ;;  %v303_v16 = vpack.c.bf16 %v34_v12, %v33_v11  ;;  %v123_v17 = vld [vmem:[%s433_s3 + $0x20] sm:$0xff]  ;;  %v124_v18 = vld [vmem:[%s433_s3 + $0x28] sm:$0xff] }
   0x5   :  { %299 = vmatprep.subr.bf16.mxu0 %v323_v0  ;;  %310 = vmatpush3.bf16.msra.mxu1 %v309_v13  ;;  %v312_v15 = vpack.c.bf16 %v122_v14, %v121_v10  ;;  %v35_v19 = vld [vmem:[%s432_s1 + $0x30] sm:$0xff]  ;;  %v36_v20 = vld [vmem:[%s432_s1 + $0x38] sm:$0xff]  ;;  %v315_v21 = vpack.c.bf16 %v124_v18, %v123_v17  ;;  %v28_v23 = vld [vmem:[%s434_s0] sm:$0xff] }
   0x6   :  { %311 = vmatprep.subr.bf16.mxu1 %v323_v0  ;;  %v306_v22 = vpack.c.bf16 %v36_v20, %v35_v19  ;;  %v125_v24 = vld [vmem:[%s433_s3 + $0x30] sm:$0xff]  ;;  %v126_v25 = vld [vmem:[%s433_s3 + $0x38] sm:$0xff]  ;;  %v234_v27 = vld [vmem:[%s435_s2] ss:$0 sm:$0xff] }
   0x7   :  { %v318_v26 = vpack.c.bf16 %v126_v25, %v125_v24  ;;  %v236_v33 = vld [vmem:[%s437_s4] ss:$0 sm:$0xff] }
   0x8   :  { %301 = vmatpush3.bf16.msra.mxu0 %v300_v7  ;;  %v238_v37 = vld [vmem:[%s438_s5] ss:$0 sm:$0xff] }
   0x9   :  { %302 = vmatprep.subr.bf16.mxu0 %v323_v0  ;;  %313 = vmatpush3.bf16.msra.mxu1 %v312_v15  ;;  %v239_v41 = vld [vmem:[#allocation2] ss:$0 sm:$0xff] }
   0xa   :  { %314 = vmatprep.subr.bf16.mxu1 %v323_v0 }
   0xc   :  { %304 = vmatpush3.bf16.msra.mxu0 %v303_v16 }
   0xd   :  { %305 = vmatprep.subr.bf16.mxu0 %v323_v0  ;;  %316 = vmatpush3.bf16.msra.mxu1 %v315_v21 }
   0xe   :  { %317 = vmatprep.subr.bf16.mxu1 %v323_v0 }
  0x10   :  { %307 = vmatpush3.bf16.msra.mxu0 %v306_v22 }
  0x11   :  { %319 = vmatpush3.bf16.msra.mxu1 %v318_v26 }
  0x13   :  { %275 = vmatmul.mubr.msk.f32.vlgmr.msra.gmra.mrb[0].mxu0 %vm44_vm1, %v28_v23 }
  0xe6   :  { %v114_v28 = vpop.f32.mrb[0].mxu0 }
  0xe7   :  { %v115_v29 = vadd.f32 %v234_v27, %v114_v28  ;;  %v276_v30 = vpop.f32.mrb[1].mxu0 }
  0xe9   :  { %v118_v31 = vmax.f32 %v115_v29, 0.0 }
  0xeb   :  { %294 = vmatmul.mubr.msk.f32.vlgmr.msra.gmra.mrb[0].mxu1 %vm44_vm1, %v118_v31 }
 0x1be   :  { %v203_v34 = vpop.f32.mrb[0].mxu1 }
 0x1bf   :  { %v204_v35 = vadd.f32 %v236_v33, %v203_v34  ;;  %v295_v36 = vpop.f32.mrb[1].mxu1 }
 0x1c1   :  { %v207_v38 = vmax.f32 %v204_v35, 0.0 }
 0x1c3   :  { %v215_v39 = vmul.f32 %v238_v37, %v207_v38 }
 0x1c5   :  { %v217_v40 = vsel %vm216_vm2, %v215_v39, 0.0 }
 0x1c6   :  { %218 = vadd.xlane.f32.xlu0 %v217_v40 }
 0x253   :  { %v219_v42 = vpop.xlane.xlu0 %218 }
 0x254   :  { %v227_v43 = vadd.f32 %v239_v41, %v219_v42 }
 0x256   :  { %229 = vst.msk [vmem:[%s439_s7] sm:$0xff] %vm228_vm3, %v227_v43 }

</bundles_post_ra>
